<compile_context>
chip_gen: v7x
topology: tpu7x:2x2x1
jax: 0.10.0
libtpu: 0.0.40
codegen_flags: <defaults>
</compile_context>

<pallas_src>
import functools

import jax
import jax.numpy as jnp
from jax.experimental import pallas as pl
from jax.experimental.pallas import tpu as pltpu


def conv2d_tap_kernel(x_ref, w_ref, b_ref, o_ref, *, nb, tap_offsets, ohw):
    """One grid step processes `nb` images.

    x_ref : (nb, Cin, H*W + KW-1) f32  flattened, tail-padded images
    w_ref : (KH*KW, Cout, Cin)    f32  per-tap weight matrices (VMEM-resident)
    b_ref : (Cout, 1)             f32  bias column
    o_ref : (nb, Cout, OH*W)      f32  lane-dense output (columns >= OW wrap-junk)
    """
    cout = b_ref.shape[0]
    # Hoist the broadcast once per grid step (JAX does not CSE broadcast_in_dim).
    bias = jnp.broadcast_to(b_ref[...], (cout, ohw))         # (Cout, OH*W)

    for n in range(nb):                                       # static unroll over images
        acc = bias                                            # bias folded into acc init
        for t, off in enumerate(tap_offsets):                 # static unroll (KH*KW taps)
            patch = x_ref[n, :, off:off + ohw]                # (Cin, OH*W) contiguous slice
            acc = acc + jnp.dot(w_ref[t], patch,              # (Cout, OH*W) on the MXU
                                preferred_element_type=jnp.float32)
        o_ref[n] = acc                                        # (Cout, OH*W)


def conv2d_forward(x, weight, bias, *, images_per_block=None):
    """Equivalent of nn.Conv2d(3, 6, 3, stride=1, padding=0)(x); x is NCHW f32."""
    n, cin, h, w = x.shape
    cout, cin_w, kh, kw = weight.shape
    assert cin == cin_w
    oh, ow = h - kh + 1, w - kw + 1
    ohw = oh * w                      # output columns per image (lane axis)
    hwp = h * w + (kw - 1)            # flattened spatial length incl. tail pad

    if images_per_block is None:
        images_per_block = next(d for d in (8, 4, 2, 1) if n % d == 0)
    nb = images_per_block
    assert n % nb == 0, "batch must be divisible by images_per_block"

    # Flatten spatial dims (free reshape) and pad the tail so every tap window of
    # width OH*W starting at offset kh*W + kw stays in bounds.
    x_flat = jnp.pad(x.reshape(n, cin, h * w).astype(jnp.float32),
                     ((0, 0), (0, 0), (0, kw - 1)))

    # Per-tap weight matrices (tiny, VMEM-resident across the grid) and bias as a
    # (Cout, 1) column so it broadcasts over the lane axis inside the kernel.
    w_taps = weight.transpose(2, 3, 0, 1).reshape(kh * kw, cout, cin).astype(jnp.float32)
    b_col = bias.reshape(cout, 1).astype(jnp.float32)

    tap_offsets = tuple(i * w + j for i in range(kh) for j in range(kw))

    kernel = functools.partial(
        conv2d_tap_kernel, nb=nb, tap_offsets=tap_offsets, ohw=ohw)

    out_flat = pl.pallas_call(
        kernel,
        out_shape=jax.ShapeDtypeStruct((n, cout, ohw), jnp.float32),
        grid_spec=pltpu.PrefetchScalarGridSpec(
            num_scalar_prefetch=0,
            grid=(n // nb,),
            in_specs=[
                pl.BlockSpec((nb, cin, hwp), lambda i: (i, 0, 0)),
                pl.BlockSpec((kh * kw, cout, cin), lambda i: (0, 0, 0)),
                pl.BlockSpec((cout, 1), lambda i: (0, 0)),
            ],
            out_specs=pl.BlockSpec((nb, cout, ohw), lambda i: (i, 0, 0)),
        ),
        compiler_params=pltpu.CompilerParams(
            dimension_semantics=("parallel",)),
    )(x_flat, w_taps, b_col)                                  # (N, Cout, OH*W)

    # (N, Cout, OH*W) -> (N, Cout, OH, W) -> drop the W-OW wrap-around columns.
    out = out_flat.reshape(n, cout, oh, w)[:, :, :, :ow]
    return out


if __name__ == "__main__":
    key = jax.random.PRNGKey(0)
    k_x, k_w, k_b = jax.random.split(key, 3)

    # Shapes implied by the module: NCHW input, Cin=3, 3x3 kernel, Cout=6.
    N, Cin, H, W = 2, 3, 16, 16
    Cout, KH, KW = 6, 3, 3

    x = jax.random.normal(k_x, (N, Cin, H, W), dtype=jnp.float32)

    # Deterministic parameter init (mirrors PyTorch's uniform(-1/sqrt(fan_in), +..)).
    fan_in = Cin * KH * KW
    bound = 1.0 / jnp.sqrt(jnp.float32(fan_in))
    weight = jax.random.uniform(k_w, (Cout, Cin, KH, KW), jnp.float32, -bound, bound)
    bias = jax.random.uniform(k_b, (Cout,), jnp.float32, -bound, bound)

    out = conv2d_forward(x, weight, bias)
    out = jax.block_until_ready(out)

    # Sanity check against XLA's reference convolution.
    ref = jax.lax.conv_general_dilated(
        x, weight, window_strides=(1, 1), padding="VALID",
        dimension_numbers=("NCHW", "OIHW", "NCHW")) + bias[None, :, None, None]
    assert out.shape == (N, Cout, H - KH + 1, W - KW + 1)
    assert jnp.allclose(out, ref, atol=1e-4, rtol=1e-4)

    print("KERNEL_OK")
</pallas_src>

<mosaic_0001>
module attributes {stable_mosaic.version = 11 : i64} {
  func.func @conv2d_tap_kernel(%arg0: i32, %arg1: memref<2x3x258xf32, #tpu.memory_space<vmem>>, %arg2: memref<9x6x3xf32, #tpu.memory_space<vmem>>, %arg3: memref<6x1xf32, #tpu.memory_space<vmem>>, %arg4: memref<2x6x224xf32, #tpu.memory_space<vmem>>) attributes {dimension_semantics = [#tpu.dimension_semantics<parallel>], iteration_bounds = array<i64: 1>, scalar_prefetch = 0 : i64, scratch_operands = 0 : i64, tpu.core_type = #tpu.core_type<tc>, window_params = [{transform_indices = @transform_0, window_bounds = array<i64: 2, 3, 258>}, {pipeline_mode = #tpu.pipeline_mode<synchronous>, transform_indices = @transform_1, window_bounds = array<i64: 9, 6, 3>}, {pipeline_mode = #tpu.pipeline_mode<synchronous>, transform_indices = @transform_2, window_bounds = array<i64: 6, 1>}, {transform_indices = @transform_3, window_bounds = array<i64: 2, 6, 224>}]} {
    %c0 = arith.constant 0 : index
    %c0_0 = arith.constant 0 : index
    %0 = vector.load %arg3[%c0, %c0_0] : memref<6x1xf32, #tpu.memory_space<vmem>>, vector<6x1xf32>
    %1 = vector.shape_cast %0 : vector<6x1xf32> to vector<6x1xf32>
    %2 = vector.broadcast %1 : vector<6x1xf32> to vector<6x224xf32>
    %c0_1 = arith.constant 0 : index
    %c0_2 = arith.constant 0 : index
    %c0_3 = arith.constant 0 : index
    %3 = vector.load %arg1[%c0_1, %c0_2, %c0_3] : memref<2x3x258xf32, #tpu.memory_space<vmem>>, vector<1x3x224xf32>
    %4 = vector.shape_cast %3 : vector<1x3x224xf32> to vector<3x224xf32>
    %c0_4 = arith.constant 0 : index
    %c0_5 = arith.constant 0 : index
    %c0_6 = arith.constant 0 : index
    %5 = vector.load %arg2[%c0_4, %c0_5, %c0_6] : memref<9x6x3xf32, #tpu.memory_space<vmem>>, vector<1x6x3xf32>
    %6 = vector.shape_cast %5 : vector<1x6x3xf32> to vector<6x3xf32>
    %cst = arith.constant dense<0.000000e+00> : vector<6x224xf32>
    %7 = tpu.matmul %6, %4, %cst {dimension_numbers = #tpu.dot_dimension_numbers<[1], [0], [0], [1], [0, 0, 1, 1], [], []>} : vector<6x3xf32>, vector<3x224xf32>, vector<6x224xf32> -> vector<6x224xf32>
    %8 = arith.addf %2, %7 : vector<6x224xf32>
    %c0_7 = arith.constant 0 : index
    %c0_8 = arith.constant 0 : index
    %c1 = arith.constant 1 : index
    %9 = vector.load %arg1[%c0_7, %c0_8, %c1] : memref<2x3x258xf32, #tpu.memory_space<vmem>>, vector<1x3x224xf32>
    %10 = vector.shape_cast %9 : vector<1x3x224xf32> to vector<3x224xf32>
    %c1_9 = arith.constant 1 : index
    %c0_10 = arith.constant 0 : index
    %c0_11 = arith.constant 0 : index
    %11 = vector.load %arg2[%c1_9, %c0_10, %c0_11] : memref<9x6x3xf32, #tpu.memory_space<vmem>>, vector<1x6x3xf32>
    %12 = vector.shape_cast %11 : vector<1x6x3xf32> to vector<6x3xf32>
    %cst_12 = arith.constant dense<0.000000e+00> : vector<6x224xf32>
    %13 = tpu.matmul %12, %10, %cst_12 {dimension_numbers = #tpu.dot_dimension_numbers<[1], [0], [0], [1], [0, 0, 1, 1], [], []>} : vector<6x3xf32>, vector<3x224xf32>, vector<6x224xf32> -> vector<6x224xf32>
    %14 = arith.addf %8, %13 : vector<6x224xf32>
    %c0_13 = arith.constant 0 : index
    %c0_14 = arith.constant 0 : index
    %c2 = arith.constant 2 : index
    %15 = vector.load %arg1[%c0_13, %c0_14, %c2] : memref<2x3x258xf32, #tpu.memory_space<vmem>>, vector<1x3x224xf32>
    %16 = vector.shape_cast %15 : vector<1x3x224xf32> to vector<3x224xf32>
    %c2_15 = arith.constant 2 : index
    %c0_16 = arith.constant 0 : index
    %c0_17 = arith.constant 0 : index
    %17 = vector.load %arg2[%c2_15, %c0_16, %c0_17] : memref<9x6x3xf32, #tpu.memory_space<vmem>>, vector<1x6x3xf32>
    %18 = vector.shape_cast %17 : vector<1x6x3xf32> to vector<6x3xf32>
    %cst_18 = arith.constant dense<0.000000e+00> : vector<6x224xf32>
    %19 = tpu.matmul %18, %16, %cst_18 {dimension_numbers = #tpu.dot_dimension_numbers<[1], [0], [0], [1], [0, 0, 1, 1], [], []>} : vector<6x3xf32>, vector<3x224xf32>, vector<6x224xf32> -> vector<6x224xf32>
    %20 = arith.addf %14, %19 : vector<6x224xf32>
    %c0_19 = arith.constant 0 : index
    %c0_20 = arith.constant 0 : index
    %c16 = arith.constant 16 : index
    %21 = vector.load %arg1[%c0_19, %c0_20, %c16] : memref<2x3x258xf32, #tpu.memory_space<vmem>>, vector<1x3x224xf32>
    %22 = vector.shape_cast %21 : vector<1x3x224xf32> to vector<3x224xf32>
    %c3 = arith.constant 3 : index
    %c0_21 = arith.constant 0 : index
    %c0_22 = arith.constant 0 : index
    %23 = vector.load %arg2[%c3, %c0_21, %c0_22] : memref<9x6x3xf32, #tpu.memory_space<vmem>>, vector<1x6x3xf32>
    %24 = vector.shape_cast %23 : vector<1x6x3xf32> to vector<6x3xf32>
    %cst_23 = arith.constant dense<0.000000e+00> : vector<6x224xf32>
    %25 = tpu.matmul %24, %22, %cst_23 {dimension_numbers = #tpu.dot_dimension_numbers<[1], [0], [0], [1], [0, 0, 1, 1], [], []>} : vector<6x3xf32>, vector<3x224xf32>, vector<6x224xf32> -> vector<6x224xf32>
    %26 = arith.addf %20, %25 : vector<6x224xf32>
    %c0_24 = arith.constant 0 : index
    %c0_25 = arith.constant 0 : index
    %c17 = arith.constant 17 : index
    %27 = vector.load %arg1[%c0_24, %c0_25, %c17] : memref<2x3x258xf32, #tpu.memory_space<vmem>>, vector<1x3x224xf32>
    %28 = vector.shape_cast %27 : vector<1x3x224xf32> to vector<3x224xf32>
    %c4 = arith.constant 4 : index
    %c0_26 = arith.constant 0 : index
    %c0_27 = arith.constant 0 : index
    %29 = vector.load %arg2[%c4, %c0_26, %c0_27] : memref<9x6x3xf32, #tpu.memory_space<vmem>>, vector<1x6x3xf32>
    %30 = vector.shape_cast %29 : vector<1x6x3xf32> to vector<6x3xf32>
    %cst_28 = arith.constant dense<0.000000e+00> : vector<6x224xf32>
    %31 = tpu.matmul %30, %28, %cst_28 {dimension_numbers = #tpu.dot_dimension_numbers<[1], [0], [0], [1], [0, 0, 1, 1], [], []>} : vector<6x3xf32>, vector<3x224xf32>, vector<6x224xf32> -> vector<6x224xf32>
    %32 = arith.addf %26, %31 : vector<6x224xf32>
    %c0_29 = arith.constant 0 : index
    %c0_30 = arith.constant 0 : index
    %c18 = arith.constant 18 : index
    %33 = vector.load %arg1[%c0_29, %c0_30, %c18] : memref<2x3x258xf32, #tpu.memory_space<vmem>>, vector<1x3x224xf32>
    %34 = vector.shape_cast %33 : vector<1x3x224xf32> to vector<3x224xf32>
    %c5 = arith.constant 5 : index
    %c0_31 = arith.constant 0 : index
    %c0_32 = arith.constant 0 : index
    %35 = vector.load %arg2[%c5, %c0_31, %c0_32] : memref<9x6x3xf32, #tpu.memory_space<vmem>>, vector<1x6x3xf32>
    %36 = vector.shape_cast %35 : vector<1x6x3xf32> to vector<6x3xf32>
    %cst_33 = arith.constant dense<0.000000e+00> : vector<6x224xf32>
    %37 = tpu.matmul %36, %34, %cst_33 {dimension_numbers = #tpu.dot_dimension_numbers<[1], [0], [0], [1], [0, 0, 1, 1], [], []>} : vector<6x3xf32>, vector<3x224xf32>, vector<6x224xf32> -> vector<6x224xf32>
    %38 = arith.addf %32, %37 : vector<6x224xf32>
    %c0_34 = arith.constant 0 : index
    %c0_35 = arith.constant 0 : index
    %c32 = arith.constant 32 : index
    %39 = vector.load %arg1[%c0_34, %c0_35, %c32] : memref<2x3x258xf32, #tpu.memory_space<vmem>>, vector<1x3x224xf32>
    %40 = vector.shape_cast %39 : vector<1x3x224xf32> to vector<3x224xf32>
    %c6 = arith.constant 6 : index
    %c0_36 = arith.constant 0 : index
    %c0_37 = arith.constant 0 : index
    %41 = vector.load %arg2[%c6, %c0_36, %c0_37] : memref<9x6x3xf32, #tpu.memory_space<vmem>>, vector<1x6x3xf32>
    %42 = vector.shape_cast %41 : vector<1x6x3xf32> to vector<6x3xf32>
    %cst_38 = arith.constant dense<0.000000e+00> : vector<6x224xf32>
    %43 = tpu.matmul %42, %40, %cst_38 {dimension_numbers = #tpu.dot_dimension_numbers<[1], [0], [0], [1], [0, 0, 1, 1], [], []>} : vector<6x3xf32>, vector<3x224xf32>, vector<6x224xf32> -> vector<6x224xf32>
    %44 = arith.addf %38, %43 : vector<6x224xf32>
    %c0_39 = arith.constant 0 : index
    %c0_40 = arith.constant 0 : index
    %c33 = arith.constant 33 : index
    %45 = vector.load %arg1[%c0_39, %c0_40, %c33] : memref<2x3x258xf32, #tpu.memory_space<vmem>>, vector<1x3x224xf32>
    %46 = vector.shape_cast %45 : vector<1x3x224xf32> to vector<3x224xf32>
    %c7 = arith.constant 7 : index
    %c0_41 = arith.constant 0 : index
    %c0_42 = arith.constant 0 : index
    %47 = vector.load %arg2[%c7, %c0_41, %c0_42] : memref<9x6x3xf32, #tpu.memory_space<vmem>>, vector<1x6x3xf32>
    %48 = vector.shape_cast %47 : vector<1x6x3xf32> to vector<6x3xf32>
    %cst_43 = arith.constant dense<0.000000e+00> : vector<6x224xf32>
    %49 = tpu.matmul %48, %46, %cst_43 {dimension_numbers = #tpu.dot_dimension_numbers<[1], [0], [0], [1], [0, 0, 1, 1], [], []>} : vector<6x3xf32>, vector<3x224xf32>, vector<6x224xf32> -> vector<6x224xf32>
    %50 = arith.addf %44, %49 : vector<6x224xf32>
    %c0_44 = arith.constant 0 : index
    %c0_45 = arith.constant 0 : index
    %c34 = arith.constant 34 : index
    %51 = vector.load %arg1[%c0_44, %c0_45, %c34] : memref<2x3x258xf32, #tpu.memory_space<vmem>>, vector<1x3x224xf32>
    %52 = vector.shape_cast %51 : vector<1x3x224xf32> to vector<3x224xf32>
    %c8 = arith.constant 8 : index
    %c0_46 = arith.constant 0 : index
    %c0_47 = arith.constant 0 : index
    %53 = vector.load %arg2[%c8, %c0_46, %c0_47] : memref<9x6x3xf32, #tpu.memory_space<vmem>>, vector<1x6x3xf32>
    %54 = vector.shape_cast %53 : vector<1x6x3xf32> to vector<6x3xf32>
    %cst_48 = arith.constant dense<0.000000e+00> : vector<6x224xf32>
    %55 = tpu.matmul %54, %52, %cst_48 {dimension_numbers = #tpu.dot_dimension_numbers<[1], [0], [0], [1], [0, 0, 1, 1], [], []>} : vector<6x3xf32>, vector<3x224xf32>, vector<6x224xf32> -> vector<6x224xf32>
    %56 = arith.addf %50, %55 : vector<6x224xf32>
    %c0_49 = arith.constant 0 : index
    %c0_50 = arith.constant 0 : index
    %c0_51 = arith.constant 0 : index
    %57 = vector.load %arg4[%c0_49, %c0_50, %c0_51] : memref<2x6x224xf32, #tpu.memory_space<vmem>>, vector<1x6x224xf32>
    %58 = vector.shape_cast %57 : vector<1x6x224xf32> to vector<6x224xf32>
    %59 = vector.shape_cast %56 : vector<6x224xf32> to vector<1x6x224xf32>
    tpu.vector_store %arg4[%c0_49, %c0_50, %c0_51], %59 {strides = array<i32>} : memref<2x6x224xf32, #tpu.memory_space<vmem>>, vector<1x6x224xf32>,
    %c1_52 = arith.constant 1 : index
    %c0_53 = arith.constant 0 : index
    %c0_54 = arith.constant 0 : index
    %60 = vector.load %arg1[%c1_52, %c0_53, %c0_54] : memref<2x3x258xf32, #tpu.memory_space<vmem>>, vector<1x3x224xf32>
    %61 = vector.shape_cast %60 : vector<1x3x224xf32> to vector<3x224xf32>
    %c0_55 = arith.constant 0 : index
    %c0_56 = arith.constant 0 : index
    %c0_57 = arith.constant 0 : index
    %62 = vector.load %arg2[%c0_55, %c0_56, %c0_57] : memref<9x6x3xf32, #tpu.memory_space<vmem>>, vector<1x6x3xf32>
    %63 = vector.shape_cast %62 : vector<1x6x3xf32> to vector<6x3xf32>
    %cst_58 = arith.constant dense<0.000000e+00> : vector<6x224xf32>
    %64 = tpu.matmul %63, %61, %cst_58 {dimension_numbers = #tpu.dot_dimension_numbers<[1], [0], [0], [1], [0, 0, 1, 1], [], []>} : vector<6x3xf32>, vector<3x224xf32>, vector<6x224xf32> -> vector<6x224xf32>
    %65 = arith.addf %2, %64 : vector<6x224xf32>
    %c1_59 = arith.constant 1 : index
    %c0_60 = arith.constant 0 : index
    %c1_61 = arith.constant 1 : index
    %66 = vector.load %arg1[%c1_59, %c0_60, %c1_61] : memref<2x3x258xf32, #tpu.memory_space<vmem>>, vector<1x3x224xf32>
    %67 = vector.shape_cast %66 : vector<1x3x224xf32> to vector<3x224xf32>
    %c1_62 = arith.constant 1 : index
    %c0_63 = arith.constant 0 : index
    %c0_64 = arith.constant 0 : index
    %68 = vector.load %arg2[%c1_62, %c0_63, %c0_64] : memref<9x6x3xf32, #tpu.memory_space<vmem>>, vector<1x6x3xf32>
    %69 = vector.shape_cast %68 : vector<1x6x3xf32> to vector<6x3xf32>
    %cst_65 = arith.constant dense<0.000000e+00> : vector<6x224xf32>
    %70 = tpu.matmul %69, %67, %cst_65 {dimension_numbers = #tpu.dot_dimension_numbers<[1], [0], [0], [1], [0, 0, 1, 1], [], []>} : vector<6x3xf32>, vector<3x224xf32>, vector<6x224xf32> -> vector<6x224xf32>
    %71 = arith.addf %65, %70 : vector<6x224xf32>
    %c1_66 = arith.constant 1 : index
    %c0_67 = arith.constant 0 : index
    %c2_68 = arith.constant 2 : index
    %72 = vector.load %arg1[%c1_66, %c0_67, %c2_68] : memref<2x3x258xf32, #tpu.memory_space<vmem>>, vector<1x3x224xf32>
    %73 = vector.shape_cast %72 : vector<1x3x224xf32> to vector<3x224xf32>
    %c2_69 = arith.constant 2 : index
    %c0_70 = arith.constant 0 : index
    %c0_71 = arith.constant 0 : index
    %74 = vector.load %arg2[%c2_69, %c0_70, %c0_71] : memref<9x6x3xf32, #tpu.memory_space<vmem>>, vector<1x6x3xf32>
    %75 = vector.shape_cast %74 : vector<1x6x3xf32> to vector<6x3xf32>
    %cst_72 = arith.constant dense<0.000000e+00> : vector<6x224xf32>
    %76 = tpu.matmul %75, %73, %cst_72 {dimension_numbers = #tpu.dot_dimension_numbers<[1], [0], [0], [1], [0, 0, 1, 1], [], []>} : vector<6x3xf32>, vector<3x224xf32>, vector<6x224xf32> -> vector<6x224xf32>
    %77 = arith.addf %71, %76 : vector<6x224xf32>
    %c1_73 = arith.constant 1 : index
    %c0_74 = arith.constant 0 : index
    %c16_75 = arith.constant 16 : index
    %78 = vector.load %arg1[%c1_73, %c0_74, %c16_75] : memref<2x3x258xf32, #tpu.memory_space<vmem>>, vector<1x3x224xf32>
    %79 = vector.shape_cast %78 : vector<1x3x224xf32> to vector<3x224xf32>
    %c3_76 = arith.constant 3 : index
    %c0_77 = arith.constant 0 : index
    %c0_78 = arith.constant 0 : index
    %80 = vector.load %arg2[%c3_76, %c0_77, %c0_78] : memref<9x6x3xf32, #tpu.memory_space<vmem>>, vector<1x6x3xf32>
    %81 = vector.shape_cast %80 : vector<1x6x3xf32> to vector<6x3xf32>
    %cst_79 = arith.constant dense<0.000000e+00> : vector<6x224xf32>
    %82 = tpu.matmul %81, %79, %cst_79 {dimension_numbers = #tpu.dot_dimension_numbers<[1], [0], [0], [1], [0, 0, 1, 1], [], []>} : vector<6x3xf32>, vector<3x224xf32>, vector<6x224xf32> -> vector<6x224xf32>
    %83 = arith.addf %77, %82 : vector<6x224xf32>
    %c1_80 = arith.constant 1 : index
    %c0_81 = arith.constant 0 : index
    %c17_82 = arith.constant 17 : index
    %84 = vector.load %arg1[%c1_80, %c0_81, %c17_82] : memref<2x3x258xf32, #tpu.memory_space<vmem>>, vector<1x3x224xf32>
    %85 = vector.shape_cast %84 : vector<1x3x224xf32> to vector<3x224xf32>
    %c4_83 = arith.constant 4 : index
    %c0_84 = arith.constant 0 : index
    %c0_85 = arith.constant 0 : index
    %86 = vector.load %arg2[%c4_83, %c0_84, %c0_85] : memref<9x6x3xf32, #tpu.memory_space<vmem>>, vector<1x6x3xf32>
    %87 = vector.shape_cast %86 : vector<1x6x3xf32> to vector<6x3xf32>
    %cst_86 = arith.constant dense<0.000000e+00> : vector<6x224xf32>
    %88 = tpu.matmul %87, %85, %cst_86 {dimension_numbers = #tpu.dot_dimension_numbers<[1], [0], [0], [1], [0, 0, 1, 1], [], []>} : vector<6x3xf32>, vector<3x224xf32>, vector<6x224xf32> -> vector<6x224xf32>
    %89 = arith.addf %83, %88 : vector<6x224xf32>
    %c1_87 = arith.constant 1 : index
    %c0_88 = arith.constant 0 : index
    %c18_89 = arith.constant 18 : index
    %90 = vector.load %arg1[%c1_87, %c0_88, %c18_89] : memref<2x3x258xf32, #tpu.memory_space<vmem>>, vector<1x3x224xf32>
    %91 = vector.shape_cast %90 : vector<1x3x224xf32> to vector<3x224xf32>
    %c5_90 = arith.constant 5 : index
    %c0_91 = arith.constant 0 : index
    %c0_92 = arith.constant 0 : index
    %92 = vector.load %arg2[%c5_90, %c0_91, %c0_92] : memref<9x6x3xf32, #tpu.memory_space<vmem>>, vector<1x6x3xf32>
    %93 = vector.shape_cast %92 : vector<1x6x3xf32> to vector<6x3xf32>
    %cst_93 = arith.constant dense<0.000000e+00> : vector<6x224xf32>
    %94 = tpu.matmul %93, %91, %cst_93 {dimension_numbers = #tpu.dot_dimension_numbers<[1], [0], [0], [1], [0, 0, 1, 1], [], []>} : vector<6x3xf32>, vector<3x224xf32>, vector<6x224xf32> -> vector<6x224xf32>
    %95 = arith.addf %89, %94 : vector<6x224xf32>
    %c1_94 = arith.constant 1 : index
    %c0_95 = arith.constant 0 : index
    %c32_96 = arith.constant 32 : index
    %96 = vector.load %arg1[%c1_94, %c0_95, %c32_96] : memref<2x3x258xf32, #tpu.memory_space<vmem>>, vector<1x3x224xf32>
    %97 = vector.shape_cast %96 : vector<1x3x224xf32> to vector<3x224xf32>
    %c6_97 = arith.constant 6 : index
    %c0_98 = arith.constant 0 : index
    %c0_99 = arith.constant 0 : index
    %98 = vector.load %arg2[%c6_97, %c0_98, %c0_99] : memref<9x6x3xf32, #tpu.memory_space<vmem>>, vector<1x6x3xf32>
    %99 = vector.shape_cast %98 : vector<1x6x3xf32> to vector<6x3xf32>
    %cst_100 = arith.constant dense<0.000000e+00> : vector<6x224xf32>
    %100 = tpu.matmul %99, %97, %cst_100 {dimension_numbers = #tpu.dot_dimension_numbers<[1], [0], [0], [1], [0, 0, 1, 1], [], []>} : vector<6x3xf32>, vector<3x224xf32>, vector<6x224xf32> -> vector<6x224xf32>
    %101 = arith.addf %95, %100 : vector<6x224xf32>
    %c1_101 = arith.constant 1 : index
    %c0_102 = arith.constant 0 : index
    %c33_103 = arith.constant 33 : index
    %102 = vector.load %arg1[%c1_101, %c0_102, %c33_103] : memref<2x3x258xf32, #tpu.memory_space<vmem>>, vector<1x3x224xf32>
    %103 = vector.shape_cast %102 : vector<1x3x224xf32> to vector<3x224xf32>
    %c7_104 = arith.constant 7 : index
    %c0_105 = arith.constant 0 : index
    %c0_106 = arith.constant 0 : index
    %104 = vector.load %arg2[%c7_104, %c0_105, %c0_106] : memref<9x6x3xf32, #tpu.memory_space<vmem>>, vector<1x6x3xf32>
    %105 = vector.shape_cast %104 : vector<1x6x3xf32> to vector<6x3xf32>
    %cst_107 = arith.constant dense<0.000000e+00> : vector<6x224xf32>
    %106 = tpu.matmul %105, %103, %cst_107 {dimension_numbers = #tpu.dot_dimension_numbers<[1], [0], [0], [1], [0, 0, 1, 1], [], []>} : vector<6x3xf32>, vector<3x224xf32>, vector<6x224xf32> -> vector<6x224xf32>
    %107 = arith.addf %101, %106 : vector<6x224xf32>
    %c1_108 = arith.constant 1 : index
    %c0_109 = arith.constant 0 : index
    %c34_110 = arith.constant 34 : index
    %108 = vector.load %arg1[%c1_108, %c0_109, %c34_110] : memref<2x3x258xf32, #tpu.memory_space<vmem>>, vector<1x3x224xf32>
    %109 = vector.shape_cast %108 : vector<1x3x224xf32> to vector<3x224xf32>
    %c8_111 = arith.constant 8 : index
    %c0_112 = arith.constant 0 : index
    %c0_113 = arith.constant 0 : index
    %110 = vector.load %arg2[%c8_111, %c0_112, %c0_113] : memref<9x6x3xf32, #tpu.memory_space<vmem>>, vector<1x6x3xf32>
    %111 = vector.shape_cast %110 : vector<1x6x3xf32> to vector<6x3xf32>
    %cst_114 = arith.constant dense<0.000000e+00> : vector<6x224xf32>
    %112 = tpu.matmul %111, %109, %cst_114 {dimension_numbers = #tpu.dot_dimension_numbers<[1], [0], [0], [1], [0, 0, 1, 1], [], []>} : vector<6x3xf32>, vector<3x224xf32>, vector<6x224xf32> -> vector<6x224xf32>
    %113 = arith.addf %107, %112 : vector<6x224xf32>
    %c1_115 = arith.constant 1 : index
    %c0_116 = arith.constant 0 : index
    %c0_117 = arith.constant 0 : index
    %114 = vector.load %arg4[%c1_115, %c0_116, %c0_117] : memref<2x6x224xf32, #tpu.memory_space<vmem>>, vector<1x6x224xf32>
    %115 = vector.shape_cast %114 : vector<1x6x224xf32> to vector<6x224xf32>
    %116 = vector.shape_cast %113 : vector<6x224xf32> to vector<1x6x224xf32>
    tpu.vector_store %arg4[%c1_115, %c0_116, %c0_117], %116 {strides = array<i32>} : memref<2x6x224xf32, #tpu.memory_space<vmem>>, vector<1x6x224xf32>,
    return
  }
  func.func @transform_0(%arg0: i32) -> (i32, i32, i32) {
    %c0_i32 = arith.constant 0 : i32
    %c0_i32_0 = arith.constant 0 : i32
    %c0_i32_1 = arith.constant 0 : i32
    return %arg0, %c0_i32, %c0_i32_0 : i32, i32, i32
  }
  func.func @transform_1(%arg0: i32) -> (i32, i32, i32) {
    %c0_i32 = arith.constant 0 : i32
    %c0_i32_0 = arith.constant 0 : i32
    %c0_i32_1 = arith.constant 0 : i32
    %c0_i32_2 = arith.constant 0 : i32
    return %c0_i32, %c0_i32_0, %c0_i32_1 : i32, i32, i32
  }
  func.func @transform_2(%arg0: i32) -> (i32, i32) {
    %c0_i32 = arith.constant 0 : i32
    %c0_i32_0 = arith.constant 0 : i32
    %c0_i32_1 = arith.constant 0 : i32
    return %c0_i32, %c0_i32_0 : i32, i32
  }
  func.func @transform_3(%arg0: i32) -> (i32, i32, i32) {
    %c0_i32 = arith.constant 0 : i32
    %c0_i32_0 = arith.constant 0 : i32
    %c0_i32_1 = arith.constant 0 : i32
    return %arg0, %c0_i32, %c0_i32_0 : i32, i32, i32
  }
}

</mosaic_0001>

<bundles_post_ra>
// kernel: tpu_custom_call.1
= control target key start
LH: loop header
LB: loop body
LE: loop exit
PB: predicated region body
PF: predicated region fallthrough
CT: control target
= control target key end

     0   :  { %v1809_v2 = vmov 0.0   ;;  %s1810_s16 = smov 127   ;;  %vm28_vm0 = vcmask 1042432   ;;  %s1811_s25 = smov 126   ;;  %vm24_vm1 = vcmask 23552   ;;  %v1817_v41 = vmov 0   ;;  %s2054_s0 = inlined_call_operand.vmem [shape: f32[2,3,258], index: 0, kind: input, shape index: {}]   ;;  %s2055_s1 = inlined_call_operand.vmem [shape: f32[9,6,3], index: 1, kind: input, shape index: {}]   ;;  %s2056_s2 = inlined_call_operand.vmem [shape: f32[6,1], index: 2, kind: input, shape index: {}]   ;;  %s2057_s3 = inlined_call_operand.vmem [shape: f32[2,6,224], index: 3, kind: output, shape index: {}]  }
   0x1   :  { %v1700_v0 = vld [vmem:[%s2054_s0 + $0xc] sm:$0x77]  ;;  %v106_v1 = vld [vmem:[%s2054_s0] sm:$0x77]  ;;  %97 = vmatprep.mubr.f32.mxu0 %v1809_v2  ;;  %923 = vmatprep.mubr.f32.mxu1 %v1809_v2  ;;  %s1812_s7 = smov 112   ;;  %s1813_s12 = smov 111  }
   0x2   :  { %936 = vrot.lane.b32.xlu1 %v1700_v0, %s1810_s16  ;;  %v935_v3 = vcombine.high %v1700_v0, %v1700_v0  ;;  %111 = vrot.lane.b32.xlu0 %v106_v1, %s1810_s16  ;;  %v110_v4 = vcombine.high %v106_v1, %v106_v1  ;;  %v197_v5 = vld [vmem:[%s2054_s0] sm:$0x77]  ;;  %v1705_v7 = vld [vmem:[%s2054_s0 + $0xc] sm:$0x77]  ;;  %s1814_s17 = smov 110   ;;  %s1815_s22 = smov 96  }
   0x3   :  { %v201_v6 = vcombine.high %v197_v5, %v197_v5  ;;  %v20_v8 = vld [vmem:[%s2054_s0] sm:$0x77]  ;;  %v1696_v10 = vld [vmem:[%s2054_s0 + $0xc] sm:$0x77]  ;;  %v1024_v11 = vcombine.high %v1705_v7, %v1705_v7  ;;  %v653_v33 = vld [vmem:[%s2054_s0 + $0x8] sm:$0x7]  ;;  %1790 = vset.pattern.permute.xlu0 %v1817_v41 }
   0x4   :  { %v23_v9 = vcombine.high %v20_v8, %v20_v8  ;;  %v21_v12 = vld [vmem:[%s2055_s1] sm:$0x3f]  ;;  %v851_v13 = vcombine.high %v1696_v10, %v1696_v10  ;;  %v1710_v17 = vld [vmem:[%s2054_s0 + $0xc] sm:$0x77]  ;;  %s1816_s29 = smov 95   ;;  %s1818_s11 = smov 94  }
   0x5   :  { %v288_v14 = vld [vmem:[%s2054_s0] sm:$0x77]  ;;  %v1113_v18 = vcombine.high %v1710_v17, %v1710_v17  ;;  %v1715_v21 = vld [vmem:[%s2054_s0 + $0xc] sm:$0x77]  ;;  %v1731_v36 = vld [vmem:[%s2054_s0 + $0x14] sm:$0x7] }
   0x6   :  { %938 = vrot.lane.b32.xlu1 %v935_v3, %s1810_s16  ;;  %113 = vrot.lane.b32.xlu0 %v110_v4, %s1810_s16  ;;  %v849_v15 = vld [vmem:[%s2055_s1] sm:$0x3f]  ;;  %v292_v16 = vcombine.high %v288_v14, %v288_v14  ;;  %v1202_v22 = vcombine.high %v1715_v21, %v1715_v21  ;;  %v1720_v25 = vld [vmem:[%s2054_s0 + $0xc] sm:$0x77]  ;;  %vm115_vm2 = vcmask 1039360   ;;  %vm206_vm3 = vcmask 1031168  }
   0x7   :  { %1661 = vmatprep.subr.msk.mxu0 %vm28_vm0, %v23_v9  ;;  %1697 = vmatprep.subr.msk.mxu1 %vm28_vm0, %v851_v13  ;;  %v379_v19 = vld [vmem:[%s2054_s0] sm:$0x77]  ;;  %v1291_v26 = vcombine.high %v1720_v25, %v1720_v25  ;;  %v1725_v29 = vld [vmem:[%s2054_s0 + $0xc] sm:$0x77]  ;;  %v749_v39 = vld [vmem:[%s2054_s0 + $0x8] sm:$0x7] }
   0x8   :  { %1662 = vmatpush1.msk.msra.mxu0 %vm28_vm0, %v20_v8  ;;  %1698 = vmatpush1.msk.msra.mxu1 %vm28_vm0, %v1696_v10  ;;  %v383_v20 = vcombine.high %v379_v19, %v379_v19  ;;  %v470_v23 = vld [vmem:[%s2054_s0] sm:$0x77]  ;;  %v1380_v30 = vcombine.high %v1725_v29, %v1725_v29  ;;  %v1730_v34 = vld [vmem:[%s2054_s0 + $0xc] sm:$0x77]  ;;  %v1737_v43 = vld [vmem:[%s2054_s0 + $0x14] sm:$0x7] }
   0x9   :  { %1663 = vmatmul.mubr.msk.f32.vlgmr.msra.gmra.mrb[0].mxu0 %vm24_vm1, %v21_v12  ;;  %1699 = vmatmul.mubr.msk.f32.vlgmr.msra.gmra.mrb[0].mxu1 %vm24_vm1, %v849_v15  ;;  %v474_v24 = vcombine.high %v470_v23, %v470_v23  ;;  %v561_v27 = vld [vmem:[%s2054_s0] sm:$0x77]  ;;  %v1471_v35 = vcombine.high %v1730_v34, %v1730_v34  ;;  %v1736_v40 = vld [vmem:[%s2054_s0 + $0xc] sm:$0x77]  ;;  %vm297_vm4 = vcmask 916480   ;;  %vm388_vm5 = vcmask 908288  }
   0xa   :  { %204 = vrot.lane.b32.xlu1 %v201_v6, %s1811_s25  ;;  %202 = vrot.lane.b32.xlu0 %v197_v5, %s1811_s25  ;;  %v565_v28 = vcombine.high %v561_v27, %v561_v27  ;;  %v652_v31 = vld [vmem:[%s2054_s0] sm:$0x77]  ;;  %v1565_v42 = vcombine.high %v1736_v40, %v1736_v40  ;;  %v1664_v49 = vld [vmem:[%s2055_s1 + $0x8] sm:$0x3f]  ;;  %vm479_vm6 = vcmask 900096   ;;  %vm570_vm7 = vcmask 785408  }
   0xb   :  { %188 = vmatprep.mubr.f32.mxu0 %v1809_v2  ;;  %1012 = vmatprep.mubr.f32.mxu1 %v1809_v2  ;;  %v658_v32 = vcombine.high %v652_v31, %v652_v31  ;;  %v748_v37 = vld [vmem:[%s2054_s0] sm:$0x77]  ;;  %v1701_v50 = vld [vmem:[%s2055_s1 + $0x8] sm:$0x3f]  ;;  %v1668_v58 = vld [vmem:[%s2055_s1 + $0x10] sm:$0x3f] }
   0xc   :  { %v754_v38 = vcombine.high %v748_v37, %v748_v37  ;;  %v14_v44 = vld [vmem:[%s2056_s2] sm:$0x3f]  ;;  %v1706_v59 = vld [vmem:[%s2055_s1 + $0x10] sm:$0x3f]  ;;  %v1672_v3 = vld [vmem:[%s2055_s1 + $0x18] sm:$0x3f] }
   0xd   :  { %v1711_v4 = vld [vmem:[%s2055_s1 + $0x18] sm:$0x3f]  ;;  %v1716_v12 = vld [vmem:[%s2055_s1 + $0x20] sm:$0x3f]  ;;  %vm665_vm8 = vcmask 777216   ;;  %vm761_vm9 = vcmask 769024  }
   0xe   :  { %1027 = vrot.lane.b32.xlu1 %v1024_v11, %s1811_s25  ;;  %1025 = vrot.lane.b32.xlu0 %v1705_v7, %s1811_s25  ;;  %v1676_v11 = vld [vmem:[%s2055_s1 + $0x20] sm:$0x3f]  ;;  %vm845_vm10 = vcmask 783360  }
  0x12   :  { %295 = vrot.lane.b32.xlu1 %v292_v16, %s1812_s7  ;;  %293 = vrot.lane.b32.xlu0 %v288_v14, %s1812_s7 }
  0x16   :  { %1116 = vrot.lane.b32.xlu1 %v1113_v18, %s1812_s7  ;;  %1114 = vrot.lane.b32.xlu0 %v1710_v17, %s1812_s7 }
  0x1a   :  { %386 = vrot.lane.b32.xlu1 %v383_v20, %s1813_s12  ;;  %384 = vrot.lane.b32.xlu0 %v379_v19, %s1813_s12  ;;  %v1680_v19 = vld [vmem:[%s2055_s1 + $0x28] sm:$0x3f] }
  0x1b   :  { %v1721_v20 = vld [vmem:[%s2055_s1 + $0x28] sm:$0x3f] }
  0x1e   :  { %1205 = vrot.lane.b32.xlu1 %v1202_v22, %s1813_s12  ;;  %1203 = vrot.lane.b32.xlu0 %v1715_v21, %s1813_s12 }
  0x22   :  { %477 = vrot.lane.b32.xlu1 %v474_v24, %s1814_s17  ;;  %475 = vrot.lane.b32.xlu0 %v470_v23, %s1814_s17 }
  0x26   :  { %1294 = vrot.lane.b32.xlu1 %v1291_v26, %s1814_s17  ;;  %1292 = vrot.lane.b32.xlu0 %v1720_v25, %s1814_s17 }
  0x2a   :  { %568 = vrot.lane.b32.xlu1 %v565_v28, %s1815_s22  ;;  %566 = vrot.lane.b32.xlu0 %v561_v27, %s1815_s22  ;;  %v1684_v27 = vld [vmem:[%s2055_s1 + $0x30] sm:$0x3f] }
  0x2b   :  { %v1726_v28 = vld [vmem:[%s2055_s1 + $0x30] sm:$0x3f] }
  0x2e   :  { %1383 = vrot.lane.b32.xlu1 %v1380_v30, %s1815_s22  ;;  %1381 = vrot.lane.b32.xlu0 %v1725_v29, %s1815_s22 }
  0x32   :  { %663 = vrot.lane.b32.xlu1 %v653_v33, %s1816_s29  ;;  %661 = vrot.lane.b32.xlu0 %v658_v32, %s1816_s29 }
  0x36   :  { %1476 = vrot.lane.b32.xlu1 %v1731_v36, %s1816_s29  ;;  %1474 = vrot.lane.b32.xlu0 %v1471_v35, %s1816_s29 }
  0x3a   :  { %1472 = vrot.lane.b32.xlu1 %v1730_v34, %s1816_s29  ;;  %659 = vrot.lane.b32.xlu0 %v652_v31, %s1816_s29 }
  0x3e   :  { %759 = vrot.lane.b32.xlu1 %v749_v39, %s1818_s11  ;;  %757 = vrot.lane.b32.xlu0 %v754_v38, %s1818_s11  ;;  %v1688_v38 = vld [vmem:[%s2055_s1 + $0x38] sm:$0x3f] }
  0x3f   :  { %v1732_v39 = vld [vmem:[%s2055_s1 + $0x38] sm:$0x3f] }
  0x42   :  { %1570 = vrot.lane.b32.xlu1 %v1737_v43, %s1818_s11  ;;  %1568 = vrot.lane.b32.xlu0 %v1565_v42, %s1818_s11 }
  0x46   :  { %1566 = vrot.lane.b32.xlu1 %v1736_v40, %s1818_s11  ;;  %755 = vrot.lane.b32.xlu0 %v748_v37, %s1818_s11 }
  0x4a   :  { %17 = vperm.xlu0 %1790, %v14_v44  }
  0x74   :  { %v937_v45 = vpop.permute.xlu1 %936  ;;  %v112_v46 = vpop.permute.xlu0 %111 }
  0x78   :  { %v939_v47 = vpop.permute.xlu1 %938  ;;  %v114_v48 = vpop.permute.xlu0 %113 }
  0x79   :  { %v940_v51 = vsel %vm115_vm2, %v937_v45, %v939_v47  ;;  %v116_v52 = vsel %vm115_vm2, %v112_v46, %v114_v48  ;;  %1665 = vmatprep.subr.msk.mxu0 %vm28_vm0, %v114_v48  ;;  %1702 = vmatprep.subr.msk.mxu1 %vm28_vm0, %v939_v47 }
  0x7a   :  { %1666 = vmatpush1.msk.msra.mxu0 %vm28_vm0, %v116_v52  ;;  %1703 = vmatpush1.msk.msra.mxu1 %vm28_vm0, %v940_v51 }
  0x7b   :  { %1667 = vmatmul.mubr.msk.f32.vlgmr.msra.gmra.mrb[0].mxu0 %vm24_vm1, %v1664_v49  ;;  %1704 = vmatmul.mubr.msk.f32.vlgmr.msra.gmra.mrb[0].mxu1 %vm24_vm1, %v1701_v50  ;;  %v1692_v50 = vld [vmem:[%s2055_s1 + $0x40] sm:$0x3f] }
  0x7c   :  { %v205_v53 = vpop.permute.xlu1 %204  ;;  %v203_v54 = vpop.permute.xlu0 %202  ;;  %279 = vmatprep.mubr.f32.mxu0 %v1809_v2  ;;  %1101 = vmatprep.mubr.f32.mxu1 %v1809_v2 }
  0x7d   :  { %v207_v55 = vsel %vm206_vm3, %v203_v54, %v205_v53  ;;  %1669 = vmatprep.subr.msk.mxu0 %vm28_vm0, %v205_v53 }
  0x7e   :  { %1670 = vmatpush1.msk.msra.mxu0 %vm28_vm0, %v207_v55 }
  0x80   :  { %v1028_v56 = vpop.permute.xlu1 %1027  ;;  %v1026_v57 = vpop.permute.xlu0 %1025 }
  0x81   :  { %v1029_v60 = vsel %vm206_vm3, %v1026_v57, %v1028_v56  ;;  %1707 = vmatprep.subr.msk.mxu1 %vm28_vm0, %v1028_v56 }
  0x82   :  { %1708 = vmatpush1.msk.msra.mxu1 %vm28_vm0, %v1029_v60 }
  0x83   :  { %1671 = vmatmul.mubr.msk.f32.vlgmr.msra.gmra.mrb[0].mxu0 %vm24_vm1, %v1668_v58  ;;  %1709 = vmatmul.mubr.msk.f32.vlgmr.msra.gmra.mrb[0].mxu1 %vm24_vm1, %v1706_v59 }
  0x84   :  { %v296_v61 = vpop.permute.xlu1 %295  ;;  %v294_v62 = vpop.permute.xlu0 %293  ;;  %370 = vmatprep.mubr.f32.mxu0 %v1809_v2  ;;  %1190 = vmatprep.mubr.f32.mxu1 %v1809_v2 }
  0x85   :  { %v298_v63 = vsel %vm297_vm4, %v294_v62, %v296_v61  ;;  %1673 = vmatprep.subr.msk.mxu0 %vm28_vm0, %v296_v61 }
  0x86   :  { %1674 = vmatpush1.msk.msra.mxu0 %vm28_vm0, %v298_v63 }
  0x88   :  { %v1117_v0 = vpop.permute.xlu1 %1116  ;;  %v1115_v1 = vpop.permute.xlu0 %1114 }
  0x89   :  { %v1118_v5 = vsel %vm297_vm4, %v1115_v1, %v1117_v0  ;;  %1712 = vmatprep.subr.msk.mxu1 %vm28_vm0, %v1117_v0 }
  0x8a   :  { %1713 = vmatpush1.msk.msra.mxu1 %vm28_vm0, %v1118_v5 }
  0x8b   :  { %1675 = vmatmul.mubr.msk.f32.vlgmr.msra.gmra.mrb[0].mxu0 %vm24_vm1, %v1672_v3  ;;  %1714 = vmatmul.mubr.msk.f32.vlgmr.msra.gmra.mrb[0].mxu1 %vm24_vm1, %v1711_v4 }
  0x8c   :  { %v387_v6 = vpop.permute.xlu1 %386  ;;  %v385_v7 = vpop.permute.xlu0 %384  ;;  %461 = vmatprep.mubr.f32.mxu0 %v1809_v2  ;;  %1279 = vmatprep.mubr.f32.mxu1 %v1809_v2 }
  0x8d   :  { %v389_v8 = vsel %vm388_vm5, %v385_v7, %v387_v6  ;;  %1677 = vmatprep.subr.msk.mxu0 %vm28_vm0, %v387_v6 }
  0x8e   :  { %1678 = vmatpush1.msk.msra.mxu0 %vm28_vm0, %v389_v8 }
  0x90   :  { %v1206_v9 = vpop.permute.xlu1 %1205  ;;  %v1204_v10 = vpop.permute.xlu0 %1203 }
  0x91   :  { %v1207_v13 = vsel %vm388_vm5, %v1204_v10, %v1206_v9  ;;  %1717 = vmatprep.subr.msk.mxu1 %vm28_vm0, %v1206_v9 }
  0x92   :  { %1718 = vmatpush1.msk.msra.mxu1 %vm28_vm0, %v1207_v13 }
  0x93   :  { %1679 = vmatmul.mubr.msk.f32.vlgmr.msra.gmra.mrb[0].mxu0 %vm24_vm1, %v1676_v11  ;;  %1719 = vmatmul.mubr.msk.f32.vlgmr.msra.gmra.mrb[0].mxu1 %vm24_vm1, %v1716_v12 }
  0x94   :  { %v478_v14 = vpop.permute.xlu1 %477  ;;  %v476_v15 = vpop.permute.xlu0 %475  ;;  %552 = vmatprep.mubr.f32.mxu0 %v1809_v2  ;;  %1368 = vmatprep.mubr.f32.mxu1 %v1809_v2 }
  0x95   :  { %v480_v16 = vsel %vm479_vm6, %v476_v15, %v478_v14  ;;  %1681 = vmatprep.subr.msk.mxu0 %vm28_vm0, %v478_v14 }
  0x96   :  { %1682 = vmatpush1.msk.msra.mxu0 %vm28_vm0, %v480_v16 }
  0x98   :  { %v1295_v17 = vpop.permute.xlu1 %1294  ;;  %v1293_v18 = vpop.permute.xlu0 %1292 }
  0x99   :  { %v1296_v21 = vsel %vm479_vm6, %v1293_v18, %v1295_v17  ;;  %1722 = vmatprep.subr.msk.mxu1 %vm28_vm0, %v1295_v17 }
  0x9a   :  { %1723 = vmatpush1.msk.msra.mxu1 %vm28_vm0, %v1296_v21 }
  0x9b   :  { %1683 = vmatmul.mubr.msk.f32.vlgmr.msra.gmra.mrb[0].mxu0 %vm24_vm1, %v1680_v19  ;;  %1724 = vmatmul.mubr.msk.f32.vlgmr.msra.gmra.mrb[0].mxu1 %vm24_vm1, %v1721_v20 }
  0x9c   :  { %v569_v22 = vpop.permute.xlu1 %568  ;;  %v567_v23 = vpop.permute.xlu0 %566  ;;  %643 = vmatprep.mubr.f32.mxu0 %v1809_v2  ;;  %1457 = vmatprep.mubr.f32.mxu1 %v1809_v2 }
  0x9d   :  { %v571_v24 = vsel %vm570_vm7, %v567_v23, %v569_v22  ;;  %1685 = vmatprep.subr.msk.mxu0 %vm28_vm0, %v569_v22 }
  0x9e   :  { %1686 = vmatpush1.msk.msra.mxu0 %vm28_vm0, %v571_v24 }
  0xa0   :  { %v1384_v25 = vpop.permute.xlu1 %1383  ;;  %v1382_v26 = vpop.permute.xlu0 %1381 }
  0xa1   :  { %v1385_v29 = vsel %vm570_vm7, %v1382_v26, %v1384_v25  ;;  %1727 = vmatprep.subr.msk.mxu1 %vm28_vm0, %v1384_v25 }
  0xa2   :  { %1728 = vmatpush1.msk.msra.mxu1 %vm28_vm0, %v1385_v29 }
  0xa3   :  { %1687 = vmatmul.mubr.msk.f32.vlgmr.msra.gmra.mrb[0].mxu0 %vm24_vm1, %v1684_v27  ;;  %1729 = vmatmul.mubr.msk.f32.vlgmr.msra.gmra.mrb[0].mxu1 %vm24_vm1, %v1726_v28 }
  0xa4   :  { %v664_v30 = vpop.permute.xlu1 %663  ;;  %v662_v31 = vpop.permute.xlu0 %661  ;;  %739 = vmatprep.mubr.f32.mxu0 %v1809_v2  ;;  %1551 = vmatprep.mubr.f32.mxu1 %v1809_v2 }
  0xa5   :  { %v667_v32 = vsel %vm665_vm8, %v662_v31, %v664_v30 }
  0xa6   :  { %1689 = vmatprep.subr.msk.mxu0 %vm28_vm0, %v667_v32 }
  0xa8   :  { %v1477_v33 = vpop.permute.xlu1 %1476  ;;  %v1475_v34 = vpop.permute.xlu0 %1474 }
  0xa9   :  { %v1479_v35 = vsel %vm665_vm8, %v1475_v34, %v1477_v33 }
  0xaa   :  { %1733 = vmatprep.subr.msk.mxu1 %vm28_vm0, %v1479_v35 }
  0xac   :  { %v1473_v36 = vpop.permute.xlu1 %1472  ;;  %v660_v37 = vpop.permute.xlu0 %659 }
  0xad   :  { %v1478_v40 = vsel %vm665_vm8, %v1473_v36, %v1475_v34  ;;  %v666_v41 = vsel %vm665_vm8, %v660_v37, %v662_v31 }
  0xae   :  { %1690 = vmatpush1.msk.msra.mxu0 %vm28_vm0, %v666_v41  ;;  %1734 = vmatpush1.msk.msra.mxu1 %vm28_vm0, %v1478_v40 }
  0xaf   :  { %1691 = vmatmul.mubr.msk.f32.vlgmr.msra.gmra.mrb[0].mxu0 %vm24_vm1, %v1688_v38  ;;  %1735 = vmatmul.mubr.msk.f32.vlgmr.msra.gmra.mrb[0].mxu1 %vm24_vm1, %v1732_v39 }
  0xb0   :  { %v760_v42 = vpop.permute.xlu1 %759  ;;  %v758_v43 = vpop.permute.xlu0 %757  ;;  %835 = vmatprep.mubr.f32.mxu0 %v1809_v2  ;;  %1645 = vmatprep.mubr.f32.mxu1 %v1809_v2  ;;  %v1738_v2 = vld [vmem:[%s2055_s1 + $0x40] sm:$0x3f] }
  0xb1   :  { %v763_v44 = vsel %vm761_vm9, %v758_v43, %v760_v42 }
  0xb2   :  { %1693 = vmatprep.subr.msk.mxu0 %vm28_vm0, %v763_v44 }
  0xb4   :  { %v1571_v45 = vpop.permute.xlu1 %1570  ;;  %v1569_v46 = vpop.permute.xlu0 %1568 }
  0xb5   :  { %v1573_v47 = vsel %vm761_vm9, %v1569_v46, %v1571_v45 }
  0xb6   :  { %1739 = vmatprep.subr.msk.mxu1 %vm28_vm0, %v1573_v47 }
  0xb8   :  { %v1567_v48 = vpop.permute.xlu1 %1566  ;;  %v756_v49 = vpop.permute.xlu0 %755 }
  0xb9   :  { %v1572_v51 = vsel %vm761_vm9, %v1567_v48, %v1569_v46  ;;  %v762_v52 = vsel %vm761_vm9, %v756_v49, %v758_v43 }
  0xba   :  { %1694 = vmatpush1.msk.msra.mxu0 %vm28_vm0, %v762_v52  ;;  %1740 = vmatpush1.msk.msra.mxu1 %vm28_vm0, %v1572_v51 }
  0xbb   :  { %1695 = vmatmul.mubr.msk.f32.vlgmr.msra.gmra.mrb[0].mxu0 %vm24_vm1, %v1692_v50  ;;  %1741 = vmatmul.mubr.msk.f32.vlgmr.msra.gmra.mrb[0].mxu1 %vm24_vm1, %v1738_v2 }
  0xc9   :  { %v18_v53 = vpop.permute.xlu0 %17 }
 0x18e   :  { %v1647_v54 = vpop.f32.mrb[0].mxu1  ;;  %v837_v55 = vpop.f32.mrb[0].mxu0 }
 0x18f   :  { %v1746_v56 = vadd.f32 %v1647_v54, %v18_v53  ;;  %v1744_v57 = vadd.f32 %v837_v55, %v18_v53  ;;  %v839_v58 = vpop.f32.mrb[1].mxu0  ;;  %v1649_v59 = vpop.f32.mrb[1].mxu1 }
 0x190   :  { %v1745_v60 = vadd.f32 %v839_v58, %v18_v53  ;;  %v1747_v61 = vadd.f32 %v1649_v59, %v18_v53 }
 0x191   :  { %1742 = vst [vmem:[%s2057_s3 + $0x10] sm:$0x3f] %v1746_v56  ;;  %844 = vst [vmem:[%s2057_s3] sm:$0x3f] %v1744_v57 }
 0x192   :  { %846 = vst.msk [vmem:[%s2057_s3 + $0x8] sm:$0x3f] %vm845_vm10, %v1745_v60  ;;  %1743 = vst.msk [vmem:[%s2057_s3 + $0x18] sm:$0x3f] %vm845_vm10, %v1747_v61 }

</bundles_post_ra>
